<compile_context>
chip_gen: v6e
topology: v6e:2x2x1
jax: 0.10.0
libtpu: 0.0.40
codegen_flags: <defaults>
</compile_context>

<pallas_src>
import functools

import jax
import jax.numpy as jnp
from jax.experimental import pallas as pl
from jax.experimental.pallas import tpu as pltpu


def _mlp_kernel(x_ref, w1_ref, b1_ref, w2_ref, b2_ref, o_ref):
    # x_ref : (1, C_in, thw)     w1_ref: (hidden, C_in)   b1_ref: (hidden, 1)
    # w2_ref: (C_out, hidden)    b2_ref: (C_out, 1)       o_ref : (1, C_out, thw)
    x = x_ref[0]                                                # (C_in, thw)
    h = jnp.dot(w1_ref[...], x, preferred_element_type=jnp.float32)
    h = jnp.maximum(h + b1_ref[...], 0.0)                       # ReLU, (hidden, thw)
    out = jnp.dot(w2_ref[...], h.astype(w2_ref.dtype),
                  preferred_element_type=jnp.float32)           # (C_out, thw)
    out = out + b2_ref[...]
    o_ref[0] = out.astype(o_ref.dtype)


@functools.partial(jax.jit, static_argnames=("tile_hw", "use_bf16"))
def simple_mlp_forward(x_nchw, w1, b1, w2, b2, tile_hw=2048, use_bf16=False):
    """Pallas implementation of SimpleMLP.forward (NCHW in, NCHW out).

    x_nchw : [B, C_in, H, W]
    w1     : [C_in, hidden]   (conv1 weight [hidden, C_in, 1, 1] transposed)
    b1     : [hidden]
    w2     : [hidden, C_out]  (conv2 weight [C_out, hidden, 1, 1] transposed)
    b2     : [C_out]
    returns: [B, C_out, H, W]
    """
    B, C_in, H, W = x_nchw.shape
    hidden = w1.shape[1]
    C_out = w2.shape[1]
    HW = H * W

    # Lane-dense spatial tile: multiple of 128, capped at tile_hw (sweepable
    # 1024-4096).  At thw=2048: 2 x 3 MiB double-buffered input blocks + small
    # output blocks + ~0.13 MiB resident weights, well under the 32 MiB scoped
    # VMEM limit set below (and under v7x's 64 MiB physical VMEM).
    thw = min(int(tile_hw), pl.cdiv(HW, 128) * 128)

    # Free reshape: collapses trailing dims of a contiguous array, no HBM copy.
    x = x_nchw.reshape(B, C_in, HW)

    # Tiny one-time weight/bias preps (<0.15 MiB total; XLA constant-folds or
    # fuses these — negligible next to the [B, C_in, H*W] stream).
    w1_t = w1.T                              # (hidden, C_in)
    w2_t = w2.T                              # (C_out, hidden)
    b1_c = b1.reshape(hidden, 1).astype(jnp.float32)
    b2_c = b2.reshape(C_out, 1).astype(jnp.float32)
    if use_bf16:
        # Optional: halves HBM read bytes of the dominant [C_in, H*W] stream;
        # accumulation stays f32.  Changes numerics slightly (off by default).
        x = x.astype(jnp.bfloat16)
        w1_t = w1_t.astype(jnp.bfloat16)
        w2_t = w2_t.astype(jnp.bfloat16)

    out = pl.pallas_call(
        _mlp_kernel,
        out_shape=jax.ShapeDtypeStruct((B, C_out, HW), x_nchw.dtype),
        grid_spec=pltpu.PrefetchScalarGridSpec(
            num_scalar_prefetch=0,
            grid=(B, pl.cdiv(HW, thw)),
            in_specs=[
                pl.BlockSpec((1, C_in, thw), lambda b, t: (b, 0, t)),
                pl.BlockSpec((hidden, C_in), lambda b, t: (0, 0)),
                pl.BlockSpec((hidden, 1), lambda b, t: (0, 0)),
                pl.BlockSpec((C_out, hidden), lambda b, t: (0, 0)),
                pl.BlockSpec((C_out, 1), lambda b, t: (0, 0)),
            ],
            out_specs=pl.BlockSpec((1, C_out, thw), lambda b, t: (b, 0, t)),
        ),
        compiler_params=pltpu.CompilerParams(
            dimension_semantics=("parallel", "parallel"),
            # >= every chip's default scoped VMEM; lets v5e (16 MiB default)
            # use tile_hw up to ~4096 without hitting the Mosaic VMEM limit.
            vmem_limit_bytes=32 * 1024 * 1024,
        ),
    )(x, w1_t, b1_c, w2_t, b2_c)

    # Free reshape back to NCHW (splits trailing dim; no HBM copy, no slice).
    return out.reshape(B, C_out, H, W)


def _reference_forward(x_nchw, w1, b1, w2, b2):
    """Pure-JAX reference (same math as the PyTorch module)."""
    x = jnp.transpose(x_nchw, (0, 2, 3, 1))          # NHWC
    h = jnp.maximum(jnp.einsum("bhwc,cd->bhwd", x, w1) + b1, 0.0)
    o = jnp.einsum("bhwc,cd->bhwd", h, w2) + b2
    return jnp.transpose(o, (0, 3, 1, 2))            # NCHW


if __name__ == "__main__":
    # Module defaults: in_channels=384, num_classes=20; hidden = 64.
    # Small spatial/batch keeps the example tiny while matching the module.
    B, C_in, H, W = 2, 384, 16, 16
    hidden, num_classes = 64, 20

    key = jax.random.PRNGKey(0)
    kx, kw1, kb1, kw2, kb2 = jax.random.split(key, 5)

    x = jax.random.normal(kx, (B, C_in, H, W), dtype=jnp.float32)

    # Deterministic parameter init (fan-in scaled, like PyTorch conv default).
    s1 = 1.0 / jnp.sqrt(C_in)
    s2 = 1.0 / jnp.sqrt(hidden)
    w1 = jax.random.uniform(kw1, (C_in, hidden), jnp.float32, -s1, s1)
    b1 = jax.random.uniform(kb1, (hidden,), jnp.float32, -s1, s1)
    w2 = jax.random.uniform(kw2, (hidden, num_classes), jnp.float32, -s2, s2)
    b2 = jax.random.uniform(kb2, (num_classes,), jnp.float32, -s2, s2)

    out = simple_mlp_forward(x, w1, b1, w2, b2)
    out = jax.block_until_ready(out)

    ref = _reference_forward(x, w1, b1, w2, b2)
    assert out.shape == (B, num_classes, H, W), out.shape
    assert jnp.allclose(out, ref, atol=1e-4, rtol=1e-4), "mismatch vs reference"

    print("KERNEL_OK")
</pallas_src>

<mosaic_0001>
module attributes {stable_mosaic.version = 11 : i64} {
  func.func @_mlp_kernel(%arg0: i32, %arg1: i32, %arg2: memref<1x384x256xf32, #tpu.memory_space<vmem>>, %arg3: memref<64x384xf32, #tpu.memory_space<vmem>>, %arg4: memref<64x1xf32, #tpu.memory_space<vmem>>, %arg5: memref<20x64xf32, #tpu.memory_space<vmem>>, %arg6: memref<20x1xf32, #tpu.memory_space<vmem>>, %arg7: memref<1x20x256xf32, #tpu.memory_space<vmem>>) attributes {dimension_semantics = [#tpu.dimension_semantics<parallel>, #tpu.dimension_semantics<parallel>], iteration_bounds = array<i64: 2, 1>, scalar_prefetch = 0 : i64, scratch_operands = 0 : i64, tpu.core_type = #tpu.core_type<tc>, window_params = [{transform_indices = @transform_0, window_bounds = array<i64: 1, 384, 256>}, {pipeline_mode = #tpu.pipeline_mode<synchronous>, transform_indices = @transform_1, window_bounds = array<i64: 64, 384>}, {pipeline_mode = #tpu.pipeline_mode<synchronous>, transform_indices = @transform_2, window_bounds = array<i64: 64, 1>}, {pipeline_mode = #tpu.pipeline_mode<synchronous>, transform_indices = @transform_3, window_bounds = array<i64: 20, 64>}, {pipeline_mode = #tpu.pipeline_mode<synchronous>, transform_indices = @transform_4, window_bounds = array<i64: 20, 1>}, {transform_indices = @transform_5, window_bounds = array<i64: 1, 20, 256>}]} {
    %c0 = arith.constant 0 : index
    %c0_0 = arith.constant 0 : index
    %c0_1 = arith.constant 0 : index
    %0 = vector.load %arg2[%c0, %c0_0, %c0_1] : memref<1x384x256xf32, #tpu.memory_space<vmem>>, vector<1x384x256xf32>
    %1 = vector.shape_cast %0 : vector<1x384x256xf32> to vector<384x256xf32>
    %c0_2 = arith.constant 0 : index
    %c0_3 = arith.constant 0 : index
    %2 = vector.load %arg3[%c0_2, %c0_3] : memref<64x384xf32, #tpu.memory_space<vmem>>, vector<64x384xf32>
    %cst = arith.constant dense<0.000000e+00> : vector<64x256xf32>
    %3 = tpu.matmul %2, %1, %cst {dimension_numbers = #tpu.dot_dimension_numbers<[1], [0], [0], [1], [0, 0, 1, 1], [], []>} : vector<64x384xf32>, vector<384x256xf32>, vector<64x256xf32> -> vector<64x256xf32>
    %c0_4 = arith.constant 0 : index
    %c0_5 = arith.constant 0 : index
    %4 = vector.load %arg4[%c0_4, %c0_5] : memref<64x1xf32, #tpu.memory_space<vmem>>, vector<64x1xf32>
    %5 = vector.broadcast %4 : vector<64x1xf32> to vector<64x256xf32>
    %6 = arith.addf %3, %5 : vector<64x256xf32>
    %cst_6 = arith.constant 0.000000e+00 : f32
    %7 = vector.broadcast %cst_6 : f32 to vector<64x256xf32>
    %8 = arith.maximumf %6, %7 : vector<64x256xf32>
    %c0_7 = arith.constant 0 : index
    %c0_8 = arith.constant 0 : index
    %9 = vector.load %arg5[%c0_7, %c0_8] : memref<20x64xf32, #tpu.memory_space<vmem>>, vector<20x64xf32>
    %cst_9 = arith.constant dense<0.000000e+00> : vector<20x256xf32>
    %10 = tpu.matmul %9, %8, %cst_9 {dimension_numbers = #tpu.dot_dimension_numbers<[1], [0], [0], [1], [0, 0, 1, 1], [], []>} : vector<20x64xf32>, vector<64x256xf32>, vector<20x256xf32> -> vector<20x256xf32>
    %c0_10 = arith.constant 0 : index
    %c0_11 = arith.constant 0 : index
    %11 = vector.load %arg6[%c0_10, %c0_11] : memref<20x1xf32, #tpu.memory_space<vmem>>, vector<20x1xf32>
    %12 = vector.broadcast %11 : vector<20x1xf32> to vector<20x256xf32>
    %13 = arith.addf %10, %12 : vector<20x256xf32>
    %c0_12 = arith.constant 0 : index
    %c0_13 = arith.constant 0 : index
    %c0_14 = arith.constant 0 : index
    %14 = vector.load %arg7[%c0_12, %c0_13, %c0_14] : memref<1x20x256xf32, #tpu.memory_space<vmem>>, vector<1x20x256xf32>
    %15 = vector.shape_cast %14 : vector<1x20x256xf32> to vector<20x256xf32>
    %16 = vector.shape_cast %13 : vector<20x256xf32> to vector<1x20x256xf32>
    tpu.vector_store %arg7[%c0_12, %c0_13, %c0_14], %16 {strides = array<i32>} : memref<1x20x256xf32, #tpu.memory_space<vmem>>, vector<1x20x256xf32>,
    return
  }
  func.func @transform_0(%arg0: i32, %arg1: i32) -> (i32, i32, i32) {
    %c0_i32 = arith.constant 0 : i32
    %c0_i32_0 = arith.constant 0 : i32
    return %arg0, %c0_i32, %arg1 : i32, i32, i32
  }
  func.func @transform_1(%arg0: i32, %arg1: i32) -> (i32, i32) {
    %c0_i32 = arith.constant 0 : i32
    %c0_i32_0 = arith.constant 0 : i32
    %c0_i32_1 = arith.constant 0 : i32
    return %c0_i32, %c0_i32_0 : i32, i32
  }
  func.func @transform_2(%arg0: i32, %arg1: i32) -> (i32, i32) {
    %c0_i32 = arith.constant 0 : i32
    %c0_i32_0 = arith.constant 0 : i32
    %c0_i32_1 = arith.constant 0 : i32
    return %c0_i32, %c0_i32_0 : i32, i32
  }
  func.func @transform_3(%arg0: i32, %arg1: i32) -> (i32, i32) {
    %c0_i32 = arith.constant 0 : i32
    %c0_i32_0 = arith.constant 0 : i32
    %c0_i32_1 = arith.constant 0 : i32
    return %c0_i32, %c0_i32_0 : i32, i32
  }
  func.func @transform_4(%arg0: i32, %arg1: i32) -> (i32, i32) {
    %c0_i32 = arith.constant 0 : i32
    %c0_i32_0 = arith.constant 0 : i32
    %c0_i32_1 = arith.constant 0 : i32
    return %c0_i32, %c0_i32_0 : i32, i32
  }
  func.func @transform_5(%arg0: i32, %arg1: i32) -> (i32, i32, i32) {
    %c0_i32 = arith.constant 0 : i32
    %c0_i32_0 = arith.constant 0 : i32
    return %arg0, %c0_i32, %arg1 : i32, i32, i32
  }
}

</mosaic_0001>

<bundles_post_ra>
// kernel: simple_mlp_forward.1
= control target key start
LH: loop header
LB: loop body
LE: loop exit
PB: predicated region body
PF: predicated region fallthrough
CT: control target
= control target key end

     0   :  { %s979_s18 = smov 0   ;;  %s981_s19 = smov 0   ;;  %s1266_s0 = inlined_call_operand.vmem [shape: f32[2,384,256], index: 0, kind: input, shape index: {}]   ;;  %s1267_s1 = inlined_call_operand.vmem [shape: f32[64,384], index: 1, kind: input, shape index: {}]   ;;  %s1268_s2 = inlined_call_operand.vmem [shape: f32[64,1], index: 2, kind: input, shape index: {}]   ;;  %s1269_s3 = inlined_call_operand.vmem [shape: f32[20,64], index: 3, kind: input, shape index: {}]   ;;  %s1270_s4 = inlined_call_operand.vmem [shape: f32[20,1], index: 4, kind: input, shape index: {}]   ;;  %s1271_s5 = inlined_call_operand.vmem [shape: f32[2,20,256], index: 5, kind: output, shape index: {}]  }
   0x1   :  { %s983_s20 = smov 0  }
   0x2 LB: > { %s27_s21 = sadd.s32 1, %s941_s19  ;;  %p885_p0 = scmp.ge.s32.totalorder %s945_s20, 1  ;;  %s945_s20 = sphi %s983_s20, %s15_s20   ;;  %s941_s19 = sphi %s981_s19, %s1273_s19   ;;  %s937_s18 = sphi %s979_s18, %s1272_s18  }
   0x3   : > { %p29_p1 = scmp.ge.s32.totalorder %s27_s21, 2  ;;  %p208_p2 = scmp.lt.s32.totalorder %s945_s20, 3 }
   0x5   : > { %s1275_s21 = smov (%p29_p1, %s27_s21), 0  ;;  %p209_p3 = pnand %p885_p0, %p208_p2 }
   0x6   : > { %p245_p4 = scmp.lt.s32.totalorder (!%p209_p3), %s937_s18, 1 }
   0x7   : > { %212 = sbr.rel (%p209_p3) target bundleno = 532 (0x214), region = 40 }
   0xc   : > { %v361_v0 = vld [vmem:[%s1267_s1 + $0x8] sm:$0xff]  ;;  %v947_v1 = vmov 0.0   ;;  %s1277_s18 = smov (!%p245_p4, %s937_s18), 1  ;;  %v948_v2 = vmov 0   ;;  %vm695_vm0 = vcmask 523264  }
   0xd   : > { %496 = vmatprep.mubr.f32.mxu0 %v361_v0  ;;  %609 = vmatprep.mubr.f32.mxu1 %v947_v1  ;;  %s893_s24 = smul.u32 768, %s1277_s18 }
   0xe   : > { %922 = vset.pattern.permute.xlu1 %v948_v2  ;;  %921 = vset.pattern.permute.xlu0 %v948_v2  ;;  %s894_s15 = smul.u32 48, %s1277_s18 }
   0xf   : > { %s1007_s27 = scalar_lea.vmem %s1266_s0, %s893_s24 }
  0x10   : > { %v295_v3 = vld [vmem:[%s1007_s27 + $0xf8] sm:$0xff]  ;;  %v294_v4 = vld [vmem:[%s1007_s27 + $0xf0] sm:$0xff]  ;;  %v293_v5 = vld [vmem:[%s1007_s27 + $0xe8] sm:$0xff]  ;;  %s262_s22 = scalar_lea.vmem %s1271_s5, %s894_s15 }
  0x11   : > { %432 = vmatprep.subr.mxu0 %v295_v3  ;;  %v292_v6 = vld [vmem:[%s1007_s27 + $0xe0] sm:$0xff]  ;;  %v291_v7 = vld [vmem:[%s1007_s27 + $0xd8] sm:$0xff]  ;;  %v290_v8 = vld [vmem:[%s1007_s27 + $0xd0] sm:$0xff] }
  0x12   : > { %433 = vmatpush1.msra.mxu0 %v294_v4  ;;  %v289_v9 = vld [vmem:[%s1007_s27 + $0xc8] sm:$0xff]  ;;  %v288_v10 = vld [vmem:[%s1007_s27 + $0xc0] sm:$0xff]  ;;  %v287_v11 = vld [vmem:[%s1007_s27 + $0xb8] sm:$0xff] }
  0x13   : > { %434 = vmatprep.subr.mxu0 %v293_v5  ;;  %v286_v12 = vld [vmem:[%s1007_s27 + $0xb0] sm:$0xff]  ;;  %v285_v13 = vld [vmem:[%s1007_s27 + $0xa8] sm:$0xff]  ;;  %v284_v14 = vld [vmem:[%s1007_s27 + $0xa0] sm:$0xff] }
  0x14   : > { %435 = vmatpush1.msra.mxu0 %v292_v6  ;;  %v283_v15 = vld [vmem:[%s1007_s27 + $0x98] sm:$0xff]  ;;  %v282_v16 = vld [vmem:[%s1007_s27 + $0x90] sm:$0xff]  ;;  %v281_v19 = vld [vmem:[%s1007_s27 + $0x88] sm:$0xff] }
  0x15   : > { %436 = vmatprep.subr.mxu0 %v291_v7  ;;  %v359_v17 = vld [vmem:[%s1007_s27 + $0x2f8] sm:$0xff]  ;;  %v358_v18 = vld [vmem:[%s1007_s27 + $0x2f0] sm:$0xff]  ;;  %v357_v20 = vld [vmem:[%s1007_s27 + $0x2e8] sm:$0xff] }
  0x16   : > { %437 = vmatpush1.msra.mxu0 %v290_v8  ;;  %545 = vmatprep.subr.mxu1 %v359_v17  ;;  %v280_v21 = vld [vmem:[%s1007_s27 + $0x80] sm:$0xff]  ;;  %v355_v23 = vld [vmem:[%s1007_s27 + $0x2d8] sm:$0xff]  ;;  %v354_v25 = vld [vmem:[%s1007_s27 + $0x2d0] sm:$0xff] }
  0x17   : > { %438 = vmatprep.subr.mxu0 %v289_v9  ;;  %546 = vmatpush1.msra.mxu1 %v358_v18  ;;  %v356_v22 = vld [vmem:[%s1007_s27 + $0x2e0] sm:$0xff]  ;;  %v279_v24 = vld [vmem:[%s1007_s27 + $0x78] sm:$0xff]  ;;  %v278_v26 = vld [vmem:[%s1007_s27 + $0x70] sm:$0xff] }
  0x18   : > { %439 = vmatpush1.msra.mxu0 %v288_v10  ;;  %547 = vmatprep.subr.mxu1 %v357_v20  ;;  %v353_v27 = vld [vmem:[%s1007_s27 + $0x2c8] sm:$0xff]  ;;  %v352_v29 = vld [vmem:[%s1007_s27 + $0x2c0] sm:$0xff]  ;;  %v351_v31 = vld [vmem:[%s1007_s27 + $0x2b8] sm:$0xff] }
  0x19   : > { %440 = vmatprep.subr.mxu0 %v287_v11  ;;  %548 = vmatpush1.msra.mxu1 %v356_v22  ;;  %v277_v28 = vld [vmem:[%s1007_s27 + $0x68] sm:$0xff]  ;;  %v276_v30 = vld [vmem:[%s1007_s27 + $0x60] sm:$0xff]  ;;  %v275_v32 = vld [vmem:[%s1007_s27 + $0x58] sm:$0xff] }
  0x1a   : > { %441 = vmatpush1.msra.mxu0 %v286_v12  ;;  %549 = vmatprep.subr.mxu1 %v355_v23  ;;  %v350_v33 = vld [vmem:[%s1007_s27 + $0x2b0] sm:$0xff]  ;;  %v349_v35 = vld [vmem:[%s1007_s27 + $0x2a8] sm:$0xff]  ;;  %v348_v37 = vld [vmem:[%s1007_s27 + $0x2a0] sm:$0xff] }
  0x1b   : > { %442 = vmatprep.subr.mxu0 %v285_v13  ;;  %550 = vmatpush1.msra.mxu1 %v354_v25  ;;  %v274_v34 = vld [vmem:[%s1007_s27 + $0x50] sm:$0xff]  ;;  %v273_v36 = vld [vmem:[%s1007_s27 + $0x48] sm:$0xff]  ;;  %v272_v38 = vld [vmem:[%s1007_s27 + $0x40] sm:$0xff] }
  0x1c   : > { %443 = vmatpush1.msra.mxu0 %v284_v14  ;;  %551 = vmatprep.subr.mxu1 %v353_v27  ;;  %v347_v39 = vld [vmem:[%s1007_s27 + $0x298] sm:$0xff]  ;;  %v346_v41 = vld [vmem:[%s1007_s27 + $0x290] sm:$0xff]  ;;  %v345_v43 = vld [vmem:[%s1007_s27 + $0x288] sm:$0xff] }
  0x1d   : > { %444 = vmatprep.subr.mxu0 %v283_v15  ;;  %552 = vmatpush1.msra.mxu1 %v352_v29  ;;  %v271_v40 = vld [vmem:[%s1007_s27 + $0x38] sm:$0xff]  ;;  %v270_v42 = vld [vmem:[%s1007_s27 + $0x30] sm:$0xff]  ;;  %v269_v44 = vld [vmem:[%s1007_s27 + $0x28] sm:$0xff] }
  0x1e   : > { %445 = vmatpush1.msra.mxu0 %v282_v16  ;;  %553 = vmatprep.subr.mxu1 %v351_v31  ;;  %v344_v45 = vld [vmem:[%s1007_s27 + $0x280] sm:$0xff]  ;;  %v343_v47 = vld [vmem:[%s1007_s27 + $0x278] sm:$0xff]  ;;  %v342_v49 = vld [vmem:[%s1007_s27 + $0x270] sm:$0xff] }
  0x1f   : > { %446 = vmatprep.subr.mxu0 %v281_v19  ;;  %554 = vmatpush1.msra.mxu1 %v350_v33  ;;  %v268_v46 = vld [vmem:[%s1007_s27 + $0x20] sm:$0xff]  ;;  %v267_v48 = vld [vmem:[%s1007_s27 + $0x18] sm:$0xff]  ;;  %v266_v50 = vld [vmem:[%s1007_s27 + $0x10] sm:$0xff] }
  0x20   : > { %447 = vmatpush1.msra.mxu0 %v280_v21  ;;  %555 = vmatprep.subr.mxu1 %v349_v35  ;;  %v341_v51 = vld [vmem:[%s1007_s27 + $0x268] sm:$0xff]  ;;  %v340_v53 = vld [vmem:[%s1007_s27 + $0x260] sm:$0xff]  ;;  %v339_v55 = vld [vmem:[%s1007_s27 + $0x258] sm:$0xff] }
  0x21   : > { %448 = vmatprep.subr.mxu0 %v279_v24  ;;  %556 = vmatpush1.msra.mxu1 %v348_v37  ;;  %v265_v52 = vld [vmem:[%s1007_s27 + $0x8] sm:$0xff]  ;;  %v264_v54 = vld [vmem:[%s1007_s27] sm:$0xff]  ;;  %v327_v56 = vld [vmem:[%s1007_s27 + $0x1f8] sm:$0xff] }
  0x22   : > { %449 = vmatpush1.msra.mxu0 %v278_v26  ;;  %557 = vmatprep.subr.mxu1 %v347_v39  ;;  %v338_v57 = vld [vmem:[%s1007_s27 + $0x250] sm:$0xff]  ;;  %v337_v59 = vld [vmem:[%s1007_s27 + $0x248] sm:$0xff]  ;;  %v336_v61 = vld [vmem:[%s1007_s27 + $0x240] sm:$0xff] }
  0x23   : > { %450 = vmatprep.subr.mxu0 %v277_v28  ;;  %558 = vmatpush1.msra.mxu1 %v346_v41  ;;  %v326_v58 = vld [vmem:[%s1007_s27 + $0x1f0] sm:$0xff]  ;;  %v325_v60 = vld [vmem:[%s1007_s27 + $0x1e8] sm:$0xff]  ;;  %v324_v62 = vld [vmem:[%s1007_s27 + $0x1e0] sm:$0xff] }
  0x24   : > { %451 = vmatpush1.msra.mxu0 %v276_v30  ;;  %559 = vmatprep.subr.mxu1 %v345_v43  ;;  %v335_v63 = vld [vmem:[%s1007_s27 + $0x238] sm:$0xff]  ;;  %v334_v2 = vld [vmem:[%s1007_s27 + $0x230] sm:$0xff]  ;;  %v333_v4 = vld [vmem:[%s1007_s27 + $0x228] sm:$0xff] }
  0x25   : > { %452 = vmatprep.subr.mxu0 %v275_v32  ;;  %560 = vmatpush1.msra.mxu1 %v344_v45  ;;  %v323_v0 = vld [vmem:[%s1007_s27 + $0x1d8] sm:$0xff]  ;;  %v322_v3 = vld [vmem:[%s1007_s27 + $0x1d0] sm:$0xff]  ;;  %v321_v5 = vld [vmem:[%s1007_s27 + $0x1c8] sm:$0xff] }
  0x26   : > { %453 = vmatpush1.msra.mxu0 %v274_v34  ;;  %561 = vmatprep.subr.mxu1 %v343_v47  ;;  %v332_v6 = vld [vmem:[%s1007_s27 + $0x220] sm:$0xff]  ;;  %v331_v8 = vld [vmem:[%s1007_s27 + $0x218] sm:$0xff]  ;;  %v330_v10 = vld [vmem:[%s1007_s27 + $0x210] sm:$0xff] }
  0x27   : > { %454 = vmatprep.subr.mxu0 %v273_v36  ;;  %562 = vmatpush1.msra.mxu1 %v342_v49  ;;  %v320_v7 = vld [vmem:[%s1007_s27 + $0x1c0] sm:$0xff]  ;;  %v319_v9 = vld [vmem:[%s1007_s27 + $0x1b8] sm:$0xff]  ;;  %v318_v11 = vld [vmem:[%s1007_s27 + $0x1b0] sm:$0xff] }
  0x28   : > { %455 = vmatpush1.msra.mxu0 %v272_v38  ;;  %563 = vmatprep.subr.mxu1 %v341_v51  ;;  %v329_v12 = vld [vmem:[%s1007_s27 + $0x208] sm:$0xff]  ;;  %v328_v14 = vld [vmem:[%s1007_s27 + $0x200] sm:$0xff]  ;;  %v362_v16 = vld [vmem:[%s1267_s1 + $0x10] sm:$0xff] }
  0x29   : > { %456 = vmatprep.subr.mxu0 %v271_v40  ;;  %564 = vmatpush1.msra.mxu1 %v340_v53  ;;  %v317_v13 = vld [vmem:[%s1007_s27 + $0x1a8] sm:$0xff]  ;;  %v316_v15 = vld [vmem:[%s1007_s27 + $0x1a0] sm:$0xff]  ;;  %v315_v17 = vld [vmem:[%s1007_s27 + $0x198] sm:$0xff] }
  0x2a   : > { %457 = vmatpush1.msra.mxu0 %v270_v42  ;;  %565 = vmatprep.subr.mxu1 %v339_v55  ;;  %v314_v18 = vld [vmem:[%s1007_s27 + $0x190] sm:$0xff]  ;;  %v389_v19 = vld [vmem:[%s1268_s2 + $0x28] sm:$0xff]  ;;  %v391_v21 = vld [vmem:[%s1268_s2 + $0x38] sm:$0xff] }
  0x2b   : > { %458 = vmatprep.subr.mxu0 %v269_v44  ;;  %566 = vmatpush1.msra.mxu1 %v338_v57  ;;  %v313_v20 = vld [vmem:[%s1007_s27 + $0x188] sm:$0xff]  ;;  %v312_v22 = vld [vmem:[%s1007_s27 + $0x180] sm:$0xff]  ;;  %v311_v24 = vld [vmem:[%s1007_s27 + $0x178] sm:$0xff] }
  0x2c   : > { %459 = vmatpush1.msra.mxu0 %v268_v46  ;;  %567 = vmatprep.subr.mxu1 %v337_v59  ;;  %v365_v23 = vld [vmem:[%s1267_s1 + $0x28] sm:$0xff]  ;;  %v310_v25 = vld [vmem:[%s1007_s27 + $0x170] sm:$0xff]  ;;  %v388_v26 = vld [vmem:[%s1268_s2 + $0x20] sm:$0xff] }
  0x2d   : > { %460 = vmatprep.subr.mxu0 %v267_v48  ;;  %568 = vmatpush1.msra.mxu1 %v336_v61  ;;  %v309_v27 = vld [vmem:[%s1007_s27 + $0x168] sm:$0xff]  ;;  %v390_v28 = vld [vmem:[%s1268_s2 + $0x30] sm:$0xff]  ;;  %v308_v29 = vld [vmem:[%s1007_s27 + $0x160] sm:$0xff] }
  0x2e   : > { %461 = vmatpush1.msra.mxu0 %v266_v50  ;;  %569 = vmatprep.subr.mxu1 %v335_v63  ;;  %v368_v30 = vld [vmem:[%s1267_s1 + $0x40] sm:$0xff]  ;;  %v307_v31 = vld [vmem:[%s1007_s27 + $0x158] sm:$0xff]  ;;  %v306_v32 = vld [vmem:[%s1007_s27 + $0x150] sm:$0xff] }
  0x2f   : > { %462 = vmatprep.subr.mxu0 %v265_v52  ;;  %570 = vmatpush1.msra.mxu1 %v334_v2  ;;  %v386_v33 = vld [vmem:[%s1268_s2 + $0x10] sm:$0xff]  ;;  %v305_v34 = vld [vmem:[%s1007_s27 + $0x148] sm:$0xff]  ;;  %v387_v35 = vld [vmem:[%s1268_s2 + $0x18] sm:$0xff] }
  0x30   : > { %463 = vmatpush1.msra.mxu0 %v264_v54  ;;  %571 = vmatprep.subr.mxu1 %v333_v4  ;;  %v304_v36 = vld [vmem:[%s1007_s27 + $0x140] sm:$0xff]  ;;  %v371_v37 = vld [vmem:[%s1267_s1 + $0x58] sm:$0xff]  ;;  %v302_v39 = vld [vmem:[%s1007_s27 + $0x130] sm:$0xff] }
  0x31   : > { %464 = vmatprep.subr.mxu0 %v327_v56  ;;  %572 = vmatpush1.msra.mxu1 %v332_v6  ;;  %v303_v38 = vld [vmem:[%s1007_s27 + $0x138] sm:$0xff]  ;;  %v384_v40 = vld [vmem:[%s1268_s2] sm:$0xff]  ;;  %v301_v41 = vld [vmem:[%s1007_s27 + $0x128] sm:$0xff] }
  0x32   : > { %465 = vmatpush2.msra.mxu0 %v326_v58  ;;  %573 = vmatprep.subr.mxu1 %v331_v8  ;;  %v385_v42 = vld [vmem:[%s1268_s2 + $0x8] sm:$0xff]  ;;  %v300_v43 = vld [vmem:[%s1007_s27 + $0x120] sm:$0xff]  ;;  %v374_v44 = vld [vmem:[%s1267_s1 + $0x70] sm:$0xff] }
  0x33   : > { %466 = vmatprep.subr.mxu0 %v325_v60  ;;  %574 = vmatpush1.msra.mxu1 %v330_v10  ;;  %v299_v45 = vld [vmem:[%s1007_s27 + $0x118] sm:$0xff]  ;;  %v298_v46 = vld [vmem:[%s1007_s27 + $0x110] sm:$0xff]  ;;  %v678_v47 = vld [vmem:[%s1270_s4 + $0x8] sm:$0xff] }
  0x34   : > { %467 = vmatpush2.msra.mxu0 %v324_v62  ;;  %575 = vmatprep.subr.mxu1 %v329_v12  ;;  %v297_v48 = vld [vmem:[%s1007_s27 + $0x108] sm:$0xff]  ;;  %v677_v49 = vld [vmem:[%s1270_s4] sm:$0xff]  ;;  %v679_v54 = vld [vmem:[%s1270_s4 + $0x10] sm:$0xf] }
  0x35   : > { %468 = vmatprep.subr.mxu0 %v323_v0  ;;  %576 = vmatpush1.msra.mxu1 %v328_v14  ;;  %v296_v50 = vld [vmem:[%s1007_s27 + $0x100] sm:$0xff]  ;;  %v377_v51 = vld [vmem:[%s1267_s1 + $0x88] sm:$0xff]  ;;  %v363_v56 = vld [vmem:[%s1267_s1 + $0x18] sm:$0xff] }
  0x36   : > { %469 = vmatpush2.msra.mxu0 %v322_v3  ;;  %610 = vmatmul.mubr.f32.vlgmr.msra.gmra.mxu1 %v362_v16  ;;  %v360_v52 = vld [vmem:[%s1267_s1] sm:$0xff]  ;;  %v367_v57 = vld [vmem:[%s1267_s1 + $0x38] sm:$0xff]  ;;  %v366_v59 = vld [vmem:[%s1267_s1 + $0x30] sm:$0xff] }
  0x37   : > { %470 = vmatprep.subr.mxu0 %v321_v5  ;;  %615 = vmatprep.mubr.f32.mxu1 %v947_v1  ;;  %v364_v53 = vld [vmem:[%s1267_s1 + $0x20] sm:$0xff]  ;;  %v383_v58 = vld [vmem:[%s1267_s1 + $0xb8] sm:$0xff]  ;;  %v370_v60 = vld [vmem:[%s1267_s1 + $0x50] sm:$0xff] }
  0x38   : > { %471 = vmatpush2.msra.mxu0 %v320_v7  ;;  %419 = vperm.xlu1 %922, %v389_v19   ;;  %v380_v55 = vld [vmem:[%s1267_s1 + $0xa0] sm:$0xff]  ;;  %v369_v61 = vld [vmem:[%s1267_s1 + $0x48] sm:$0xff]  ;;  %v375_v2 = vld [vmem:[%s1267_s1 + $0x78] sm:$0xff] }
  0x39   : > { %472 = vmatprep.subr.mxu0 %v319_v9  ;;  %429 = vperm.xlu0 %921, %v391_v21   ;;  %v373_v62 = vld [vmem:[%s1267_s1 + $0x68] sm:$0xff]  ;;  %v372_v63 = vld [vmem:[%s1267_s1 + $0x60] sm:$0xff]  ;;  %v379_v3 = vld [vmem:[%s1267_s1 + $0x98] sm:$0xff] }
  0x3a   : > { %473 = vmatpush2.msra.mxu0 %v318_v11  ;;  %616 = vmatmul.mubr.f32.gmra.mxu1 %v365_v23  ;;  %v376_v0 = vld [vmem:[%s1267_s1 + $0x80] sm:$0xff]  ;;  %v378_v4 = vld [vmem:[%s1267_s1 + $0x90] sm:$0xff]  ;;  %v381_v6 = vld [vmem:[%s1267_s1 + $0xa8] sm:$0xff] }
  0x3b   : > { %474 = vmatprep.subr.mxu0 %v317_v13  ;;  %621 = vmatprep.mubr.f32.mxu1 %v947_v1  ;;  %v382_v5 = vld [vmem:[%s1267_s1 + $0xb0] sm:$0xff] }
  0x3c   : > { %475 = vmatpush2.msra.mxu0 %v316_v15  ;;  %414 = vperm.xlu1 %922, %v388_v26  }
  0x3d   : > { %476 = vmatprep.subr.mxu0 %v315_v17  ;;  %424 = vperm.xlu0 %921, %v390_v28  }
  0x3e   : > { %477 = vmatpush2.msra.mxu0 %v314_v18  ;;  %622 = vmatmul.mubr.f32.gmra.mxu1 %v368_v30 }
  0x3f   : > { %478 = vmatprep.subr.mxu0 %v313_v20  ;;  %627 = vmatprep.mubr.f32.mxu1 %v947_v1 }
  0x40   : > { %479 = vmatpush2.msra.mxu0 %v312_v22  ;;  %404 = vperm.xlu1 %922, %v386_v33  }
  0x41   : > { %480 = vmatprep.subr.mxu0 %v311_v24  ;;  %409 = vperm.xlu0 %921, %v387_v35  }
  0x42   : > { %481 = vmatpush2.msra.mxu0 %v310_v25  ;;  %628 = vmatmul.mubr.f32.gmra.mxu1 %v371_v37 }
  0x43   : > { %482 = vmatprep.subr.mxu0 %v309_v27  ;;  %633 = vmatprep.mubr.f32.mxu1 %v947_v1 }
  0x44   : > { %483 = vmatpush2.msra.mxu0 %v308_v29  ;;  %394 = vperm.xlu1 %922, %v384_v40  }
  0x45   : > { %484 = vmatprep.subr.mxu0 %v307_v31  ;;  %399 = vperm.xlu0 %921, %v385_v42  }
  0x46   : > { %485 = vmatpush2.msra.mxu0 %v306_v32  ;;  %634 = vmatmul.mubr.f32.gmra.mxu1 %v374_v44 }
  0x47   : > { %486 = vmatprep.subr.mxu0 %v305_v34  ;;  %639 = vmatprep.mubr.f32.mxu1 %v947_v1 }
  0x48   : > { %487 = vmatpush2.msra.mxu0 %v304_v36  ;;  %687 = vperm.xlu1 %922, %v678_v47  }
  0x49   : > { %488 = vmatprep.subr.mxu0 %v303_v38  ;;  %682 = vperm.xlu0 %921, %v677_v49  }
  0x4a   : > { %489 = vmatpush2.msra.mxu0 %v302_v39  ;;  %640 = vmatmul.mubr.f32.gmra.mxu1 %v377_v51 }
  0x4b   : > { %490 = vmatprep.subr.mxu0 %v301_v41  ;;  %645 = vmatprep.mubr.f32.mxu1 %v947_v1 }
  0x4c   : > { %491 = vmatpush2.msra.mxu0 %v300_v43 }
  0x4d   : > { %492 = vmatprep.subr.mxu0 %v299_v45  ;;  %692 = vperm.xlu0 %921, %v679_v54  }
  0x4e   : > { %493 = vmatpush2.msra.mxu0 %v298_v46  ;;  %646 = vmatmul.mubr.f32.gmra.mxu1 %v380_v55 }
  0x4f   : > { %494 = vmatprep.subr.mxu0 %v297_v48  ;;  %651 = vmatprep.mubr.f32.mxu1 %v947_v1 }
  0x50   : > { %495 = vmatpush2.msra.mxu0 %v296_v50 }
  0x51   : > { %497 = vmatmul.mubr.f32.vlgmr.msra.gmra.mxu0 %v360_v52 }
  0x52   : > { %502 = vmatprep.mubr.f32.mxu0 %v364_v53  ;;  %652 = vmatmul.mubr.f32.gmra.mxu1 %v383_v58 }
  0x53   : > { %769 = vmatprep.mubr.f32.mxu1 %v947_v1 }
  0x55   : > { %503 = vmatmul.mubr.f32.gmra.mxu0 %v363_v56 }
  0x56   : > { %508 = vmatprep.mubr.f32.mxu0 %v367_v57 }
  0x59   : > { %509 = vmatmul.mubr.f32.gmra.mxu0 %v366_v59 }
  0x5a   : > { %514 = vmatprep.mubr.f32.mxu0 %v370_v60 }
  0x5d   : > { %515 = vmatmul.mubr.f32.gmra.mxu0 %v369_v61 }
  0x5e   : > { %520 = vmatprep.mubr.f32.mxu0 %v373_v62 }
  0x61   : > { %521 = vmatmul.mubr.f32.gmra.mxu0 %v372_v63 }
  0x62   : > { %526 = vmatprep.mubr.f32.mxu0 %v376_v0 }
  0x65   : > { %527 = vmatmul.mubr.f32.gmra.mxu0 %v375_v2 }
  0x66   : > { %532 = vmatprep.mubr.f32.mxu0 %v379_v3 }
  0x69   : > { %533 = vmatmul.mubr.f32.gmra.mxu0 %v378_v4 }
  0x6a   : > { %538 = vmatprep.mubr.f32.mxu0 %v382_v5 }
  0x6d   : > { %539 = vmatmul.mubr.f32.gmra.mxu0 %v381_v6 }
  0xb3   : > { %v420_v32 = vpop.permute.xlu1 %419 }
  0xb4   : > { %v430_v29 = vpop.permute.xlu0 %429 }
  0xb7   : > { %v415_v38 = vpop.permute.xlu1 %414 }
  0xb8   : > { %v425_v36 = vpop.permute.xlu0 %424 }
  0xbb   : > { %v405_v51 = vpop.permute.xlu1 %404 }
  0xbc   : > { %v410_v45 = vpop.permute.xlu0 %409 }
  0xc0   : > { %v400_v63 = vpop.permute.xlu0 %399 }
  0xf6   : > { %v1215_v7 = vpop.f32.mrf.mxu1 }
  0xf8   : > { %v1217_v8 = vpop.f32.mrf.mxu1 }
  0xfa   : > { %v1219_v9 = vpop.f32.mrf.mxu1 }
  0xfc   : > { %v1221_v10 = vpop.f32.mrf.mxu1 }
  0xfe   : > { %v1223_v11 = vpop.f32.mrf.mxu1 }
 0x100   : > { %v1225_v12 = vpop.f32.mrf.mxu1 }
 0x102   : > { %v1227_v13 = vpop.f32.mrf.mxu1 }
 0x104   : > { %v631_v15 = vpop.f32.mrf.mxu1 }
 0x106   : > { %v635_v18 = vpop.f32.mrf.mxu1 }
 0x108   : > { %v637_v21 = vpop.f32.mrf.mxu1 }
 0x10a   : > { %v641_v24 = vpop.f32.mrf.mxu1 }
 0x10c   : > { %v643_v27 = vpop.f32.mrf.mxu1 }
 0x10e   : > { %v647_v31 = vpop.f32.mrf.mxu1 }
 0x110   : > { %v649_v35 = vpop.f32.mrf.mxu1 }
 0x111   : > { %v1229_v14 = vpop.f32.mrf.mxu0 }
 0x112   : > { %v653_v40 = vpop.f32.mrf.mxu1 }
 0x113   : > { %v1231_v16 = vpop.f32.mrf.mxu0 }
 0x114   : > { %v655_v50 = vpop.f32.mrf.mxu1 }
 0x115   : > { %v504_v17 = vpop.f32.mrf.mxu0 }
 0x117   : > { %v506_v19 = vpop.f32.mrf.mxu0 }
 0x119   : > { %v510_v20 = vpop.f32.mrf.mxu0 }
 0x11a   : > { %v511_v4 = vadd.f32 %v510_v20, %v405_v51 }
 0x11b   : > { %v512_v22 = vpop.f32.mrf.mxu0 }
 0x11c   : > { %v513_v0 = vadd.f32 %v512_v22, %v405_v51  ;;  %v624_v20 = vadd.f32 %v1223_v11, %v511_v4 }
 0x11d   : > { %v516_v23 = vpop.f32.mrf.mxu0 }
 0x11e   : > { %v517_v60 = vadd.f32 %v516_v23, %v410_v45 }
 0x11f   : > { %v518_v25 = vpop.f32.mrf.mxu0 }
 0x120   : > { %v519_v57 = vadd.f32 %v518_v25, %v410_v45  ;;  %v505_v25 = vadd.f32 %v504_v17, %v400_v63 }
 0x121   : > { %v522_v26 = vpop.f32.mrf.mxu0 }
 0x122   : > { %v523_v55 = vadd.f32 %v522_v26, %v415_v38 }
 0x123   : > { %v524_v28 = vpop.f32.mrf.mxu0 }
 0x124   : > { %v525_v52 = vadd.f32 %v524_v28, %v415_v38  ;;  %v636_v5 = vadd.f32 %v635_v18, %v523_v55  ;;  %v395_v28 = vpop.permute.xlu1 %394 }
 0x125   : > { %v528_v30 = vpop.f32.mrf.mxu0  ;;  %v499_v18 = vadd.f32 %v1229_v14, %v395_v28 }
 0x126   : > { %v529_v48 = vadd.f32 %v528_v30, %v420_v32  ;;  %v638_v2 = vadd.f32 %v637_v21, %v525_v52  ;;  %v632_v30 = vadd.f32 %v631_v15, %v519_v57  ;;  %v626_v21 = vadd.f32 %v1225_v12, %v513_v0 }
 0x127   : > { %v530_v33 = vpop.f32.mrf.mxu0  ;;  %v612_v12 = vadd.f32 %v1215_v7, %v499_v18  ;;  %v675_v7 = vld [vmem:[%s1269_s3 + $0x8] sm:$0xff] }
 0x128   : > { %v531_v46 = vadd.f32 %v530_v33, %v420_v32  ;;  %v642_v61 = vadd.f32 %v641_v24, %v529_v48  ;;  %v501_v24 = vadd.f32 %v1231_v16, %v395_v28  ;;  %v667_v22 = vmax.f32 %v638_v2, 0.0 }
 0x129   : > { %v534_v34 = vpop.f32.mrf.mxu0  ;;  %v663_v32 = vmax.f32 %v626_v21, 0.0  ;;  %v662_v33 = vmax.f32 %v624_v20, 0.0 }
 0x12a   : > { %v535_v43 = vadd.f32 %v534_v34, %v425_v36  ;;  %v644_v58 = vadd.f32 %v643_v27, %v531_v46  ;;  %v630_v27 = vadd.f32 %v1227_v13, %v517_v60  ;;  %v668_v23 = vmax.f32 %v642_v61, 0.0 }
 0x12b   : > { %v536_v37 = vpop.f32.mrf.mxu0  ;;  %v618_v13 = vadd.f32 %v1219_v9, %v505_v25  ;;  %v614_v16 = vadd.f32 %v1217_v8, %v501_v24  ;;  %v658_v34 = vmax.f32 %v612_v12, 0.0  ;;  %v674_v9 = vld [vmem:[%s1269_s3] sm:$0xff]  ;;  %v676_v8 = vld [vmem:[%s1269_s3 + $0x10] sm:$0xf] }
 0x12c   : > { %v537_v41 = vadd.f32 %v536_v37, %v425_v36  ;;  %v648_v56 = vadd.f32 %v647_v31, %v535_v43  ;;  %v669_v26 = vmax.f32 %v644_v58, 0.0  ;;  %v666_v31 = vmax.f32 %v636_v5, 0.0 }
 0x12d   : > { %v540_v39 = vpop.f32.mrf.mxu0  ;;  %v664_v17 = vmax.f32 %v630_v27, 0.0  ;;  %v660_v11 = vmax.f32 %v618_v13, 0.0 }
 0x12e   : > { %v541_v42 = vadd.f32 %v540_v39, %v430_v29  ;;  %v650_v53 = vadd.f32 %v649_v35, %v537_v41  ;;  %v670_v6 = vmax.f32 %v648_v56, 0.0  ;;  %v683_v35 = vpop.permute.xlu0 %682 }
 0x12f   : > { %v542_v44 = vpop.f32.mrf.mxu0 }
 0x130   : > { %v543_v47 = vadd.f32 %v542_v44, %v430_v29  ;;  %v654_v49 = vadd.f32 %v653_v40, %v541_v42  ;;  %v671_v3 = vmax.f32 %v650_v53, 0.0  ;;  %v507_v29 = vadd.f32 %v506_v19, %v400_v63  ;;  %v688_v40 = vpop.permute.xlu1 %687 }
 0x131   : > { %v665_v19 = vmax.f32 %v632_v30, 0.0 }
 0x132   : > { %v656_v54 = vadd.f32 %v655_v50, %v543_v47  ;;  %v672_v62 = vmax.f32 %v654_v49, 0.0  ;;  %v620_v15 = vadd.f32 %v1221_v10, %v507_v29  ;;  %v659_v10 = vmax.f32 %v614_v16, 0.0  ;;  %v693_v44 = vpop.permute.xlu0 %692 }
 0x134   : > { %v673_v59 = vmax.f32 %v656_v54, 0.0  ;;  %v661_v14 = vmax.f32 %v620_v15, 0.0 }
 0x136   : > { %721 = vmatprep.subr.mxu1 %v673_v59 }
 0x137   : > { %722 = vmatpush1.msra.mxu1 %v672_v62 }
 0x138   : > { %723 = vmatprep.subr.mxu1 %v671_v3 }
 0x139   : > { %724 = vmatpush1.msra.mxu1 %v670_v6 }
 0x13a   : > { %725 = vmatprep.subr.mxu1 %v669_v26 }
 0x13b   : > { %726 = vmatpush1.msra.mxu1 %v668_v23 }
 0x13c   : > { %727 = vmatprep.subr.mxu1 %v667_v22 }
 0x13d   : > { %728 = vmatpush1.msra.mxu1 %v666_v31 }
 0x13e   : > { %729 = vmatprep.subr.mxu1 %v665_v19 }
 0x13f   : > { %730 = vmatpush1.msra.mxu1 %v664_v17 }
 0x140   : > { %731 = vmatprep.subr.mxu1 %v663_v32 }
 0x141   : > { %732 = vmatpush1.msra.mxu1 %v662_v33 }
 0x142   : > { %733 = vmatprep.subr.mxu1 %v661_v14 }
 0x143   : > { %734 = vmatpush1.msra.mxu1 %v660_v11 }
 0x144   : > { %735 = vmatprep.subr.mxu1 %v659_v10 }
 0x145   : > { %736 = vmatpush1.msra.mxu1 %v658_v34 }
 0x146   : > { %888 = vmatmul.mubr.msk.f32.vlgmr.msra.gmra.mxu1 %vm695_vm0, %v674_v9 }
 0x147   : > { %775 = vmatprep.mubr.f32.mxu1 %v947_v1 }
 0x14a   : > { %889 = vmatmul.mubr.msk.f32.gmra.mxu1 %vm695_vm0, %v675_v7 }
 0x14b   : > { %781 = vmatprep.mubr.f32.mxu1 %v947_v1 }
 0x14e   : > { %890 = vmatmul.mubr.msk.f32.gmra.mxu1 %vm695_vm0, %v676_v8 }
 0x206   : > { %v771_v36 = vpop.f32.mrf.mxu1 }
 0x207   : > { %v772_v37 = vadd.f32 %v771_v36, %v683_v35 }
 0x208   : > { %v773_v38 = vpop.f32.mrf.mxu1 }
 0x209   : > { %788 = vst [vmem:[%s262_s22] sm:$0xff] %v772_v37  ;;  %v774_v39 = vadd.f32 %v773_v38, %v683_v35 }
 0x20a   : > { %v777_v41 = vpop.f32.mrf.mxu1 }
 0x20b   : > { %789 = vst [vmem:[%s262_s22 + $0x8] sm:$0xff] %v774_v39  ;;  %v778_v1 = vadd.f32 %v777_v41, %v688_v40 }
 0x20c   : > { %v779_v42 = vpop.f32.mrf.mxu1 }
 0x20d   : > { %790 = vst [vmem:[%s262_s22 + $0x10] sm:$0xff] %v778_v1  ;;  %v780_v43 = vadd.f32 %v779_v42, %v688_v40 }
 0x20e   : > { %v783_v45 = vpop.f32.mrf.mxu1 }
 0x20f   : > { %791 = vst [vmem:[%s262_s22 + $0x18] sm:$0xff] %v780_v43  ;;  %v784_v46 = vadd.f32 %v783_v45, %v693_v44 }
 0x210   : > { %v785_v47 = vpop.f32.mrf.mxu1 }
 0x211   : > { %792 = vst [vmem:[%s262_s22 + $0x20] sm:$0xf] %v784_v46  ;;  %v786_v48 = vadd.f32 %v785_v47, %v693_v44 }
 0x213   : > { %793 = vst [vmem:[%s262_s22 + $0x28] sm:$0xf] %v786_v48 }
 0x214 PF: > { %s15_s20 = sadd.s32 1, %s945_s20   ;;  %s1272_s18 = smov %s941_s19 }
 0x215   : > { %p12_p5 = scmp.ge.s32.totalorder %s15_s20, 4   ;;  %s1273_s19 = smov %s1275_s21 }
 0x217   :  { %14 = sbr.rel (!%p12_p5) target bundleno = 2 (0x2), region = 70 }

</bundles_post_ra>
